<compile_context>
chip_gen: v6e
topology: v6e:2x2x1
jax: 0.10.0
libtpu: 0.0.40
codegen_flags: <defaults>
</compile_context>

<pallas_src>
import jax
import jax.numpy as jnp
from jax.experimental import pallas as pl
from jax.experimental.pallas import tpu as pltpu


def _linear_kernel(x_ref, w_ref, b_ref, o_ref):
    # x_ref: (TB, D) block, w_ref: (1, D) resident, b_ref: (1,) scalar in SMEM.
    x = x_ref[...].astype(jnp.float32)
    w = w_ref[...].astype(jnp.float32)              # (1, D) broadcasts over rows (VPU)
    acc = jnp.sum(x * w, axis=-1, keepdims=True)    # (TB, 1) f32 row-reduce (XLU)
    o_ref[...] = (acc + b_ref[0]).astype(o_ref.dtype)


def _round_up(n, m):
    return ((n + m - 1) // m) * m


def simple_model_forward(x, weight, bias, *, block_rows=None):
    """y = x @ weight.T + bias  (nn.Linear(input_dim, 1) semantics).

    x:      [B, D]  float32 (or bf16)
    weight: [1, D]  (PyTorch layout: (out_features, in_features))
    bias:   [1]
    returns [B, 1]  in x.dtype
    """
    B, D = x.shape
    itemsize = jnp.dtype(x.dtype).itemsize

    # Pick a row-block: target ~4 MiB per x tile (double-buffered => ~8 MiB),
    # multiple of 8 sublanes, capped at 1024 rows. Safe under v5e's 16 MiB and
    # v7x's 32 MiB scoped-VMEM defaults.
    if block_rows is None:
        tb = (4 * 1024 * 1024) // max(1, D * itemsize)
        block_rows = max(8, min(1024, (tb // 8) * 8))

    # Pad batch so the block evenly divides it (keeps (8, 128) tiling rules happy;
    # padded rows are sliced off after the call).
    TB = min(block_rows, _round_up(B, 8))
    B_pad = _round_up(B, TB)
    if B_pad != B:
        x = jnp.pad(x, ((0, B_pad - B), (0, 0)))

    weight = weight.reshape(1, D).astype(x.dtype)
    bias = bias.reshape(1).astype(jnp.float32)

    grid = (B_pad // TB,)

    out = pl.pallas_call(
        _linear_kernel,
        out_shape=jax.ShapeDtypeStruct((B_pad, 1), x.dtype),
        grid_spec=pl.GridSpec(
            grid=grid,
            in_specs=[
                pl.BlockSpec((TB, D), lambda i: (i, 0)),          # x: tiled over batch
                pl.BlockSpec((1, D), lambda i: (0, 0)),           # weight: resident
                pl.BlockSpec(memory_space=pltpu.MemorySpace.SMEM),  # bias: scalar in SMEM
            ],
            out_specs=pl.BlockSpec((TB, 1), lambda i: (i, 0)),
        ),
        compiler_params=pltpu.CompilerParams(
            dimension_semantics=("parallel",),
        ),
        cost_estimate=pl.CostEstimate(
            flops=2 * B_pad * D,
            transcendentals=0,
            bytes_accessed=B_pad * D * itemsize + D * itemsize + 4 + B_pad * itemsize,
        ),
    )(x, weight, bias)

    return out[:B]


if __name__ == "__main__":
    input_dim = 32
    batch = 8

    key = jax.random.PRNGKey(0)
    kx, kw, kb = jax.random.split(key, 3)

    # Deterministic parameter init (mimicking nn.Linear's uniform init range).
    bound = 1.0 / (input_dim ** 0.5)
    weight = jax.random.uniform(kw, (1, input_dim), jnp.float32, -bound, bound)
    bias = jax.random.uniform(kb, (1,), jnp.float32, -bound, bound)

    x = jax.random.normal(kx, (batch, input_dim), jnp.float32)

    y = simple_model_forward(x, weight, bias)
    y = jax.block_until_ready(y)

    # Sanity check against plain-JAX reference of the same Linear.
    y_ref = x @ weight.T + bias
    assert y.shape == (batch, 1)
    assert jnp.allclose(y, y_ref, atol=1e-5, rtol=1e-5)

    print("KERNEL_OK")
</pallas_src>

<mosaic_0001>
module attributes {stable_mosaic.version = 11 : i64} {
  func.func @_linear_kernel(%arg0: i32, %arg1: memref<8x32xf32, #tpu.memory_space<vmem>>, %arg2: memref<1x32xf32, #tpu.memory_space<vmem>>, %arg3: memref<1xf32, #tpu.memory_space<smem>>, %arg4: memref<8x1xf32, #tpu.memory_space<vmem>>) attributes {dimension_semantics = [#tpu.dimension_semantics<parallel>], iteration_bounds = array<i64: 1>, scalar_prefetch = 0 : i64, scratch_operands = 0 : i64, tpu.core_type = #tpu.core_type<tc>, window_params = [{transform_indices = @transform_0, window_bounds = array<i64: 8, 32>}, {pipeline_mode = #tpu.pipeline_mode<synchronous>, transform_indices = @transform_1, window_bounds = array<i64: 1, 32>}, {transform_indices = @transform_2, window_bounds = array<i64: 1>}, {transform_indices = @transform_3, window_bounds = array<i64: 8, 1>}]} {
    %c0 = arith.constant 0 : index
    %c0_0 = arith.constant 0 : index
    %0 = vector.load %arg1[%c0, %c0_0] : memref<8x32xf32, #tpu.memory_space<vmem>>, vector<8x32xf32>
    %c0_1 = arith.constant 0 : index
    %c0_2 = arith.constant 0 : index
    %1 = vector.load %arg2[%c0_1, %c0_2] : memref<1x32xf32, #tpu.memory_space<vmem>>, vector<1x32xf32>
    %2 = vector.broadcast %1 : vector<1x32xf32> to vector<8x32xf32>
    %3 = arith.mulf %0, %2 : vector<8x32xf32>
    %cst = arith.constant dense<0.000000e+00> : vector<8xf32>
    %4 = vector.multi_reduction <add>, %3, %cst [1] : vector<8x32xf32> to vector<8xf32>
    %5 = vector.shape_cast %4 : vector<8xf32> to vector<8x1xf32>
    %c0_3 = arith.constant 0 : index
    %6 = memref.load %arg3[%c0_3] : memref<1xf32, #tpu.memory_space<smem>>
    %7 = vector.broadcast %6 : f32 to vector<8x1xf32>
    %8 = arith.addf %5, %7 : vector<8x1xf32>
    %c0_4 = arith.constant 0 : index
    %c0_5 = arith.constant 0 : index
    %9 = vector.load %arg4[%c0_4, %c0_5] : memref<8x1xf32, #tpu.memory_space<vmem>>, vector<8x1xf32>
    tpu.vector_store %arg4[%c0_4, %c0_5], %8 {strides = array<i32>} : memref<8x1xf32, #tpu.memory_space<vmem>>, vector<8x1xf32>,
    return
  }
  func.func @transform_0(%arg0: i32) -> (i32, i32) {
    %c0_i32 = arith.constant 0 : i32
    %c0_i32_0 = arith.constant 0 : i32
    return %arg0, %c0_i32 : i32, i32
  }
  func.func @transform_1(%arg0: i32) -> (i32, i32) {
    %c0_i32 = arith.constant 0 : i32
    %c0_i32_0 = arith.constant 0 : i32
    %c0_i32_1 = arith.constant 0 : i32
    return %c0_i32, %c0_i32_0 : i32, i32
  }
  func.func @transform_2(%arg0: i32) -> i32 {
    %c0_i32 = arith.constant 0 : i32
    %c0_i32_0 = arith.constant 0 : i32
    return %c0_i32 : i32
  }
  func.func @transform_3(%arg0: i32) -> (i32, i32) {
    %c0_i32 = arith.constant 0 : i32
    %c0_i32_0 = arith.constant 0 : i32
    return %arg0, %c0_i32 : i32, i32
  }
}

</mosaic_0001>

<bundles_post_ra>
// kernel: tpu_custom_call.1
= control target key start
LH: loop header
LB: loop body
LE: loop exit
PB: predicated region body
PF: predicated region fallthrough
CT: control target
= control target key end

     0   :  { %9 = vsyncpa [#allocation4], 0  ;;  %s74_s12 = smov [#allocation3]   ;;  %s107_s0 = inlined_call_operand.hbm [shape: f32[8,32], index: 0, kind: input, shape index: {}]   ;;  %s108_s1 = inlined_call_operand.vmem [shape: f32[1,32], index: 1, kind: input, shape index: {}]   ;;  %s109_s2 = inlined_call_operand.<no memory space> [shape: f32[1], index: 2, kind: input, shape index: {}]   ;;  %s110_s3 = inlined_call_operand.vmem [shape: f32[8,1], index: 3, kind: output, shape index: {}]  }
   0x1   :  { %s16_s13 = sshll.u32 %s74_s12, 4  ;;  %s17_s13 = int_to_ptr.vmem [resolvable:$true] %s16_s13 }
   0x2   :  { %s60_s14 = scalar_lea.vmem %s17_s13, 128  ;;  %p65_p1 = scmp.lt.s32.totalorder %s17_s13, %s17_s13 }
   0x3   :  { %p61_p0 = scmp.ne.s32.totalorder %s17_s13, %s60_s14  ;;  %p66_p2 = scmp.lt.s32.totalorder %s60_s14, %s60_s14 }
   0x5   :  { %p67_p3 = por %p66_p2, %p65_p1 }
   0x7   :  { %p68_p4 = pnand %p67_p3, %p61_p0 }
   0x9   :  { %71 = shalt.err (!%p68_p4)
}
   0xa   :  { %19 = dma.hbm_to_vmem [thread:$0]  %s107_s0, 128, %s17_s13, [#allocation4]  }
   0xb   :  { %72 = dma.done.wait [#allocation4], 128  }
   0xc   :  { %73 = vsyncadd [#allocation4], 4294967168  ;;  %v27_v0 = vld [vmem:[#allocation3] sm:$0xff]  ;;  %vm36_vm0 = vcmask 261120   ;;  %v41_v4 = vstv %s109_s2  ;;  %vm43_vm1 = vcmask 7168  }
   0xd   :  { %v50_v1 = vld [vmem:[%s108_s1] ss:$0 sm:$0xff] }
   0xe   :  { %v35_v2 = vmul.f32 %v50_v1, %v27_v0 }
  0x10   :  { %v37_v3 = vsel %vm36_vm0, %v35_v2, 0.0 }
  0x11   :  { %38 = vadd.xlane.f32.xlu0 %v37_v3 }
  0x9a   :  { %v39_v5 = vpop.xlane.xlu0 %38 }
  0x9b   :  { %v42_v6 = vadd.f32 %v41_v4, %v39_v5 }
  0x9d   :  { %44 = vst.msk [vmem:[%s110_s3] sm:$0xff] %vm43_vm1, %v42_v6 }
  0x9e   :  { %49 = vsyncpa [#allocation4], 1 }

</bundles_post_ra>
